<compile_context>
chip_gen: v5e
topology: v5e:2x2
jax: 0.10.0
libtpu: 0.0.40
codegen_flags: <defaults>
</compile_context>

<pallas_src>
import functools

import jax
import jax.numpy as jnp
from jax.experimental import pallas as pl
from jax.experimental.pallas import tpu as pltpu


def _round_up(x, m):
    return ((x + m - 1) // m) * m


def _pick_tm(B, D, T, NP):
    """Batch-tile rows: as large as possible (fewer grid steps), sublane-aligned,
    while keeping the double-buffered streamed tiles well inside VMEM."""
    tm = min(512, _round_up(max(B, 1), 8))
    # 2 buffers x f32 x (x1 + x2 + out) rows; leave plenty of headroom for the
    # resident weights and compiler scratch (clamp target is 48 MiB total).
    while tm > 8 and 2 * 4 * tm * (D + T + NP) > (24 << 20):
        tm = max(8, _round_up(tm // 2, 8))
    return tm


def fc_middlecat_kernel(x1_ref, x2_ref, w2_ref, b2_ref,
                        w3a_ref, w3b_ref, b3_ref, o_ref):
    """One grid step = one batch tile.  Fully fused; all weights VMEM-resident."""
    wdt = w2_ref.dtype

    # fc2 + ELU(alpha=1).  Bias add and activation math stay in f32.
    z = jnp.dot(x2_ref[...].astype(wdt), w2_ref[...],
                preferred_element_type=jnp.float32)
    z = z + b2_ref[...]
    # ELU: z if z > 0 else exp(z) - 1.  exp(min(z,0)) keeps the discarded
    # branch finite; see header note on why expm1 is not used.
    h = jnp.where(z > 0, z, jnp.exp(jnp.minimum(z, 0.0)) - 1.0)

    # fc3 with the concat fused away: out = x1 @ W3a + h @ W3b + b3.
    acc = jnp.dot(x1_ref[...].astype(wdt), w3a_ref[...],
                  preferred_element_type=jnp.float32)
    acc = acc + jnp.dot(h.astype(wdt), w3b_ref[...],
                        preferred_element_type=jnp.float32)
    o_ref[...] = (acc + b3_ref[...]).astype(o_ref.dtype)


def prepare_params(w2, b2, w3, b3, weights_dtype=jnp.float32):
    """One-time parameter transform (do at init time, not per forward call).

    PyTorch Linear convention:
      w2: (D, T), b2: (D,), w3: (nn_out, 2D), b3: (nn_out,)
    Returns kernel-layout params with the fc3 output dim zero-padded to a
    multiple of 128 (lane-dense stores):
      w2t (T, D), b2r (1, D), w3a (D, NP), w3b (D, NP), b3r (1, NP)
    Pass weights_dtype=jnp.bfloat16 on v5e/v6e/v7x for half the weight HBM
    bytes + bf16 MXU path (biases stay f32).
    """
    D, T = w2.shape
    nn_out, two_d = w3.shape
    assert two_d == 2 * D, "fc3 expects input size 2*deep_feature_size"
    NP = _round_up(max(nn_out, 1), 128)

    w2t = w2.T.astype(weights_dtype)                              # (T, D)
    b2r = b2.reshape(1, D).astype(jnp.float32)
    w3t = jnp.pad(w3.T, ((0, 0), (0, NP - nn_out))).astype(weights_dtype)
    w3a = w3t[:D, :]                                              # (D, NP) * x1
    w3b = w3t[D:, :]                                              # (D, NP) * h
    b3r = jnp.pad(b3.reshape(1, nn_out),
                  ((0, 0), (0, NP - nn_out))).astype(jnp.float32)
    return w2t, b2r, w3a, w3b, b3r


@functools.partial(jax.jit, static_argnames=("nn_out",))
def fc_middlecat_forward(x1, x2, w2t, b2r, w3a, w3b, b3r, *, nn_out):
    B, D = x1.shape
    _, T = x2.shape
    NP = w3a.shape[1]

    TM = _pick_tm(B, D, T, NP)
    BP = _round_up(B, TM)
    if BP != B:
        x1 = jnp.pad(x1, ((0, BP - B), (0, 0)))
        x2 = jnp.pad(x2, ((0, BP - B), (0, 0)))

    grid = (BP // TM,)

    w_item = jnp.dtype(w3a.dtype).itemsize
    weight_bytes = w_item * (T * D + 2 * D * NP) + 4 * (D + NP)
    stream_bytes = 4 * 2 * TM * (D + T + NP)   # double-buffered x1/x2/out tiles
    # Clamp at 48 MiB so the same budget is safe on v7x's 64 MiB per-core VMEM
    # (v5e/v6e have 128 MiB and are nowhere near the limit at these shapes).
    vmem_limit = int(min(max(4 * (weight_bytes + stream_bytes), 32 << 20),
                         48 << 20))

    out = pl.pallas_call(
        fc_middlecat_kernel,
        out_shape=jax.ShapeDtypeStruct((BP, NP), x1.dtype),
        grid_spec=pltpu.PrefetchScalarGridSpec(
            num_scalar_prefetch=0,
            grid=grid,
            in_specs=[
                pl.BlockSpec((TM, D), lambda i: (i, 0)),   # x1 batch tile
                pl.BlockSpec((TM, T), lambda i: (i, 0)),   # x2 batch tile
                pl.BlockSpec((T, D), lambda i: (0, 0)),    # W2^T  (resident)
                pl.BlockSpec((1, D), lambda i: (0, 0)),    # b2    (resident)
                pl.BlockSpec((D, NP), lambda i: (0, 0)),   # W3a   (resident)
                pl.BlockSpec((D, NP), lambda i: (0, 0)),   # W3b   (resident)
                pl.BlockSpec((1, NP), lambda i: (0, 0)),   # b3    (resident)
            ],
            out_specs=pl.BlockSpec((TM, NP), lambda i: (i, 0)),
        ),
        compiler_params=pltpu.CompilerParams(
            # Batch tiles are fully independent (no carried scratch), so the
            # single grid axis is megacore-shardable on v7x.
            dimension_semantics=("parallel",),
            vmem_limit_bytes=vmem_limit,
        ),
        cost_estimate=pl.CostEstimate(
            flops=2 * BP * (T * D + 2 * D * NP),
            transcendentals=BP * D,
            # Activations/output streamed once + weights DMA'd exactly once.
            bytes_accessed=4 * BP * (D + T + NP) + weight_bytes,
        ),
    )(x1, x2, w2t, b2r, w3a, w3b, b3r)

    return out[:B, :nn_out]


if __name__ == "__main__":
    # Small shapes consistent with the module:
    #   deep_feature_size D, trad_feature_size T, nn_out; batch B.
    B, D, T, NN_OUT = 10, 16, 8, 24

    key = jax.random.PRNGKey(0)
    k1, k2, k3, k4, k5, k6 = jax.random.split(key, 6)

    x1 = jax.random.normal(k1, (B, D), dtype=jnp.float32)
    x2 = jax.random.normal(k2, (B, T), dtype=jnp.float32)

    # PyTorch-style Linear init U(-1/sqrt(fan_in), 1/sqrt(fan_in)).
    # fc1 is defined in the module but unused in forward, so it is omitted.
    bnd2 = 1.0 / (T ** 0.5)
    w2 = jax.random.uniform(k3, (D, T), jnp.float32, -bnd2, bnd2)
    b2 = jax.random.uniform(k4, (D,), jnp.float32, -bnd2, bnd2)
    bnd3 = 1.0 / ((2 * D) ** 0.5)
    w3 = jax.random.uniform(k5, (NN_OUT, 2 * D), jnp.float32, -bnd3, bnd3)
    b3 = jax.random.uniform(k6, (NN_OUT,), jnp.float32, -bnd3, bnd3)

    params = prepare_params(w2, b2, w3, b3)   # weights_dtype=jnp.bfloat16 on v5e/v6e for speed
    out = fc_middlecat_forward(x1, x2, *params, nn_out=NN_OUT)
    jax.block_until_ready(out)

    # Pure-JAX reference: fc2 -> ELU -> cat -> fc3.
    h = jax.nn.elu(x2 @ w2.T + b2)
    ref = jnp.concatenate([x1, h], axis=1) @ w3.T + b3

    assert out.shape == (B, NN_OUT)
    assert jnp.allclose(out, ref, atol=1e-5, rtol=1e-5), float(
        jnp.max(jnp.abs(out - ref)))

    print("KERNEL_OK")
</pallas_src>

<mosaic_0001>
module attributes {stable_mosaic.version = 11 : i64} {
  func.func @fc_middlecat_kernel(%arg0: i32, %arg1: memref<16x16xf32, #tpu.memory_space<vmem>>, %arg2: memref<16x8xf32, #tpu.memory_space<vmem>>, %arg3: memref<8x16xf32, #tpu.memory_space<vmem>>, %arg4: memref<1x16xf32, #tpu.memory_space<vmem>>, %arg5: memref<16x128xf32, #tpu.memory_space<vmem>>, %arg6: memref<16x128xf32, #tpu.memory_space<vmem>>, %arg7: memref<1x128xf32, #tpu.memory_space<vmem>>, %arg8: memref<16x128xf32, #tpu.memory_space<vmem>>) attributes {dimension_semantics = [#tpu.dimension_semantics<parallel>], iteration_bounds = array<i64: 1>, scalar_prefetch = 0 : i64, scratch_operands = 0 : i64, tpu.core_type = #tpu.core_type<tc>, window_params = [{transform_indices = @transform_0, window_bounds = array<i64: 16, 16>}, {transform_indices = @transform_1, window_bounds = array<i64: 16, 8>}, {pipeline_mode = #tpu.pipeline_mode<synchronous>, transform_indices = @transform_2, window_bounds = array<i64: 8, 16>}, {pipeline_mode = #tpu.pipeline_mode<synchronous>, transform_indices = @transform_3, window_bounds = array<i64: 1, 16>}, {pipeline_mode = #tpu.pipeline_mode<synchronous>, transform_indices = @transform_4, window_bounds = array<i64: 16, 128>}, {pipeline_mode = #tpu.pipeline_mode<synchronous>, transform_indices = @transform_5, window_bounds = array<i64: 16, 128>}, {pipeline_mode = #tpu.pipeline_mode<synchronous>, transform_indices = @transform_6, window_bounds = array<i64: 1, 128>}, {transform_indices = @transform_7, window_bounds = array<i64: 16, 128>}]} {
    %c0 = arith.constant 0 : index
    %c0_0 = arith.constant 0 : index
    %0 = vector.load %arg2[%c0, %c0_0] : memref<16x8xf32, #tpu.memory_space<vmem>>, vector<16x8xf32>
    %c0_1 = arith.constant 0 : index
    %c0_2 = arith.constant 0 : index
    %1 = vector.load %arg3[%c0_1, %c0_2] : memref<8x16xf32, #tpu.memory_space<vmem>>, vector<8x16xf32>
    %cst = arith.constant dense<0.000000e+00> : vector<16x16xf32>
    %2 = tpu.matmul %0, %1, %cst {dimension_numbers = #tpu.dot_dimension_numbers<[1], [0], [0], [1], [0, 0, 1, 1], [], []>} : vector<16x8xf32>, vector<8x16xf32>, vector<16x16xf32> -> vector<16x16xf32>
    %c0_3 = arith.constant 0 : index
    %c0_4 = arith.constant 0 : index
    %3 = vector.load %arg4[%c0_3, %c0_4] : memref<1x16xf32, #tpu.memory_space<vmem>>, vector<1x16xf32>
    %4 = vector.broadcast %3 : vector<1x16xf32> to vector<16x16xf32>
    %5 = arith.addf %2, %4 : vector<16x16xf32>
    %cst_5 = arith.constant 0.000000e+00 : f32
    %6 = vector.broadcast %cst_5 : f32 to vector<16x16xf32>
    %7 = arith.cmpf ogt, %5, %6 : vector<16x16xf32>
    %cst_6 = arith.constant 0.000000e+00 : f32
    %8 = vector.broadcast %cst_6 : f32 to vector<16x16xf32>
    %9 = arith.minimumf %5, %8 : vector<16x16xf32>
    %10 = math.exp %9 : vector<16x16xf32>
    %cst_7 = arith.constant 1.000000e+00 : f32
    %11 = vector.broadcast %cst_7 : f32 to vector<16x16xf32>
    %12 = arith.subf %10, %11 : vector<16x16xf32>
    %13 = arith.select %7, %5, %12 : vector<16x16xi1>, vector<16x16xf32>
    %c0_8 = arith.constant 0 : index
    %c0_9 = arith.constant 0 : index
    %14 = vector.load %arg1[%c0_8, %c0_9] : memref<16x16xf32, #tpu.memory_space<vmem>>, vector<16x16xf32>
    %c0_10 = arith.constant 0 : index
    %c0_11 = arith.constant 0 : index
    %15 = vector.load %arg5[%c0_10, %c0_11] : memref<16x128xf32, #tpu.memory_space<vmem>>, vector<16x128xf32>
    %cst_12 = arith.constant dense<0.000000e+00> : vector<16x128xf32>
    %16 = tpu.matmul %14, %15, %cst_12 {dimension_numbers = #tpu.dot_dimension_numbers<[1], [0], [0], [1], [0, 0, 1, 1], [], []>} : vector<16x16xf32>, vector<16x128xf32>, vector<16x128xf32> -> vector<16x128xf32>
    %c0_13 = arith.constant 0 : index
    %c0_14 = arith.constant 0 : index
    %17 = vector.load %arg6[%c0_13, %c0_14] : memref<16x128xf32, #tpu.memory_space<vmem>>, vector<16x128xf32>
    %cst_15 = arith.constant dense<0.000000e+00> : vector<16x128xf32>
    %18 = tpu.matmul %13, %17, %cst_15 {dimension_numbers = #tpu.dot_dimension_numbers<[1], [0], [0], [1], [0, 0, 1, 1], [], []>} : vector<16x16xf32>, vector<16x128xf32>, vector<16x128xf32> -> vector<16x128xf32>
    %19 = arith.addf %16, %18 : vector<16x128xf32>
    %c0_16 = arith.constant 0 : index
    %c0_17 = arith.constant 0 : index
    %20 = vector.load %arg7[%c0_16, %c0_17] : memref<1x128xf32, #tpu.memory_space<vmem>>, vector<1x128xf32>
    %21 = vector.broadcast %20 : vector<1x128xf32> to vector<16x128xf32>
    %22 = arith.addf %19, %21 : vector<16x128xf32>
    %c0_18 = arith.constant 0 : index
    %c0_19 = arith.constant 0 : index
    %23 = vector.load %arg8[%c0_18, %c0_19] : memref<16x128xf32, #tpu.memory_space<vmem>>, vector<16x128xf32>
    tpu.vector_store %arg8[%c0_18, %c0_19], %22 {strides = array<i32>} : memref<16x128xf32, #tpu.memory_space<vmem>>, vector<16x128xf32>,
    return
  }
  func.func @transform_0(%arg0: i32) -> (i32, i32) {
    %c0_i32 = arith.constant 0 : i32
    %c0_i32_0 = arith.constant 0 : i32
    return %arg0, %c0_i32 : i32, i32
  }
  func.func @transform_1(%arg0: i32) -> (i32, i32) {
    %c0_i32 = arith.constant 0 : i32
    %c0_i32_0 = arith.constant 0 : i32
    return %arg0, %c0_i32 : i32, i32
  }
  func.func @transform_2(%arg0: i32) -> (i32, i32) {
    %c0_i32 = arith.constant 0 : i32
    %c0_i32_0 = arith.constant 0 : i32
    %c0_i32_1 = arith.constant 0 : i32
    return %c0_i32, %c0_i32_0 : i32, i32
  }
  func.func @transform_3(%arg0: i32) -> (i32, i32) {
    %c0_i32 = arith.constant 0 : i32
    %c0_i32_0 = arith.constant 0 : i32
    %c0_i32_1 = arith.constant 0 : i32
    return %c0_i32, %c0_i32_0 : i32, i32
  }
  func.func @transform_4(%arg0: i32) -> (i32, i32) {
    %c0_i32 = arith.constant 0 : i32
    %c0_i32_0 = arith.constant 0 : i32
    %c0_i32_1 = arith.constant 0 : i32
    return %c0_i32, %c0_i32_0 : i32, i32
  }
  func.func @transform_5(%arg0: i32) -> (i32, i32) {
    %c0_i32 = arith.constant 0 : i32
    %c0_i32_0 = arith.constant 0 : i32
    %c0_i32_1 = arith.constant 0 : i32
    return %c0_i32, %c0_i32_0 : i32, i32
  }
  func.func @transform_6(%arg0: i32) -> (i32, i32) {
    %c0_i32 = arith.constant 0 : i32
    %c0_i32_0 = arith.constant 0 : i32
    %c0_i32_1 = arith.constant 0 : i32
    return %c0_i32, %c0_i32_0 : i32, i32
  }
  func.func @transform_7(%arg0: i32) -> (i32, i32) {
    %c0_i32 = arith.constant 0 : i32
    %c0_i32_0 = arith.constant 0 : i32
    return %arg0, %c0_i32 : i32, i32
  }
}

</mosaic_0001>

<bundles_post_ra>
// kernel: fc_middlecat_forward.1
= control target key start
LH: loop header
LB: loop body
LE: loop exit
PB: predicated region body
PF: predicated region fallthrough
CT: control target
= control target key end

     0   :  { %vm34_vm0 = vcmask 64512   ;;  %s295_s0 = inlined_call_operand.vmem [shape: f32[16,16], index: 0, kind: input, shape index: {}]   ;;  %s296_s1 = inlined_call_operand.vmem [shape: f32[16,8], index: 1, kind: input, shape index: {}]   ;;  %s297_s2 = inlined_call_operand.vmem [shape: f32[8,16], index: 2, kind: input, shape index: {}]   ;;  %s298_s3 = inlined_call_operand.vmem [shape: f32[1,16], index: 3, kind: input, shape index: {}]   ;;  %s299_s4 = inlined_call_operand.vmem [shape: f32[16,128], index: 4, kind: input, shape index: {}]   ;;  %s300_s5 = inlined_call_operand.vmem [shape: f32[16,128], index: 5, kind: input, shape index: {}]   ;;  %s301_s6 = inlined_call_operand.vmem [shape: f32[1,128], index: 6, kind: input, shape index: {}]   ;;  %s302_s7 = inlined_call_operand.hbm [shape: f32[16,128], index: 7, kind: output, shape index: {}]  }
   0x1   :  { %v29_v0 = vld [vmem:[%s297_s2] sm:$0xff] }
   0x2   :  { %v27_v1 = vld [vmem:[%s296_s1] sm:$0xff]  ;;  %56 = vmatpush.msra.mxu0 %v29_v0 }
   0x3   :  { %167 = vmatmul.msk.f32.vlgmr.msra.gmra.mxu0 %vm34_vm0, %v27_v1 }
   0x4   :  { %12 = vsyncpa [#allocation3], 0  ;;  %v28_v2 = vld [vmem:[%s296_s1 + $0x8] sm:$0xff]  ;;  %v78_v4 = vld [vmem:[%s299_s4] sm:$0xff]  ;;  %vm82_vm1 = vcmask 130048   ;;  %s155_s21 = sshll.u32 %s302_s7, 4  ;;  %s156_s21 = int_to_ptr.hbm [resolvable:$true] %s155_s21 }
   0x5   :  { %v79_v3 = vld [vmem:[%s299_s4 + $0x8] sm:$0xff]  ;;  %v76_v5 = vld [vmem:[%s295_s0] sm:$0xff]  ;;  %s213_s22 = smov 128   ;;  %s214_s23 = smov 8  }
   0x6   :  { %132 = vmatpush.msra.mxu2 %v79_v3  ;;  %v81_v6 = vld [vmem:[%s300_s5 + $0x8] sm:$0xff]  ;;  %v80_v7 = vld [vmem:[%s300_s5] sm:$0xff]  ;;  %s212_s5 = smov [#allocation2]  }
   0x7   :  { %103 = vmatpush.msra.mxu1 %v81_v6  ;;  %175 = vmatpush.msra.mxu3 %v81_v6  ;;  %v77_v8 = vld [vmem:[%s295_s0 + $0x8] sm:$0xff]  ;;  %v180_v9 = vld [vmem:[%s298_s3] ss:$0 sm:$0xff]  ;;  %s153_s18 = sshll.u32 %s212_s5, 4  ;;  %s154_s18 = int_to_ptr.vmem [resolvable:$true] %s153_s18 }
   0x8   :  { %133 = vmatpush.msra.mxu2 %v78_v4  ;;  %v181_v25 = vld [vmem:[%s301_s6] ss:$0 sm:$0xff] }
   0x9   :  { %173 = vmatmul.msk.f32.vlgmr.msra.gmra.mxu2 %vm82_vm1, %v76_v5  ;;  %104 = vmatpush.msra.mxu1 %v80_v7 }
   0xa   :  { %176 = vmatpush.msra.mxu3 %v80_v7 }
   0xb   :  { %168 = vmatmul.msk.f32.gmra.mxu0 %vm34_vm0, %v28_v2 }
  0x11   :  { %174 = vmatmul.msk.f32.gmra.mxu2 %vm82_vm1, %v77_v8 }
  0x80   :  { %v58_v10 = vpop.f32.mrf.mxu0 }
  0x81   :  { %v59_v11 = vadd.f32 %v180_v9, %v58_v10 }
  0x83   :  { %v66_v12 = vmin.f32 %v59_v11, 0.0  ;;  %vm64_vm2 = vcmp.gt.f32.partialorder %v59_v11, 0.0 }
  0x85   :  { %v68_v13 = vmul.f32 1.442695, %v66_v12 }
  0x87   :  { %182 = vpow2.f32 %v68_v13 }
  0x88   :  { %v61_v14 = vpop.f32.mrf.mxu0 }
  0x89   :  { %v62_v15 = vadd.f32 %v180_v9, %v61_v14 }
  0x8b   :  { %v67_v16 = vmin.f32 %v62_v15, 0.0  ;;  %vm65_vm3 = vcmp.gt.f32.partialorder %v62_v15, 0.0 }
  0x8c   :  { %v135_v24 = vpop.f32.mrf.mxu2 }
  0x8d   :  { %v183_v17 = vpop.eup %182  ;;  %v70_v18 = vmul.f32 1.442695, %v67_v16 }
  0x8e   :  { %v169_v19 = vadd.f32 -1.0, %v183_v17 }
  0x8f   :  { %184 = vpow2.f32 %v70_v18 }
  0x90   :  { %v74_v20 = vsel %vm64_vm2, %v59_v11, %v169_v19 }
  0x91   :  { %171 = vmatmul.msk.f32.vlgmr.msra.gmra.mxu1 %vm82_vm1, %v74_v20 }
  0x94   :  { %v138_v29 = vpop.f32.mrf.mxu2 }
  0x95   :  { %v185_v21 = vpop.eup %184 }
  0x96   :  { %v170_v22 = vadd.f32 -1.0, %v185_v21 }
  0x98   :  { %v75_v23 = vsel %vm65_vm3, %v62_v15, %v170_v22 }
  0x99   :  { %172 = vmatmul.msk.f32.vlgmr.msra.gmra.mxu3 %vm82_vm1, %v75_v23 }
 0x10e   :  { %v106_v26 = vpop.f32.mrf.mxu1 }
 0x10f   :  { %v136_v27 = vadd.f32 %v135_v24, %v106_v26 }
 0x111   :  { %v145_v28 = vadd.f32 %v181_v25, %v136_v27 }
 0x113   :  { %147 = vst [vmem:[#allocation2] sm:$0xff] %v145_v28 }
 0x11c   :  { %v109_v30 = vpop.f32.mrf.mxu3 }
 0x11d   :  { %v139_v31 = vadd.f32 %v138_v29, %v109_v30 }
 0x11f   :  { %v146_v32 = vadd.f32 %v181_v25, %v139_v31 }
 0x121   :  { %148 = vst [vmem:[#allocation2 + $0x8] sm:$0xff] %v146_v32 }
 0x122   :  { %161 = dma.vmem_to_hbm [thread:$0]  %s154_s18, 256, %s156_s21, [#allocation3], %s213_s22, %s213_s22, %s214_s23  }
 0x123   :  { %210 = dma.done.wait [#allocation3], 256  }
 0x124   :  { %211 = vsyncadd [#allocation3], 4294967040 }
 0x125   :  { %166 = vsyncpa [#allocation3], 1 }

</bundles_post_ra>
